<compile_context>
chip_gen: v6e
topology: v6e:2x2x1
jax: 0.10.0
libtpu: 0.0.40
codegen_flags: <defaults>
</compile_context>

<pallas_src>
import functools

import jax
import jax.numpy as jnp
from jax.experimental import pallas as pl
from jax.experimental.pallas import tpu as pltpu


def _round_up(x, m):
    return ((x + m - 1) // m) * m


def output_block_kernel(h_ref, batch_ref, wcat_ref, bcat_ref, w2_ref, b2_ref,
                        out_ref, *, hh_pad):
    """One node-tile step: fused lin1+w_lin -> SiLU -> lin2 -> *alpha -> scatter."""
    i = pl.program_id(1)                       # node-tile (reduction) axis, "arbitrary"

    @pl.when(i == 0)
    def _():
        out_ref[...] = jnp.zeros(out_ref.shape, out_ref.dtype)

    h = h_ref[...]                             # native dtype -> native MXU path

    # Fused lin1 + w_lin: single contraction over the hidden dim of h.
    z = jnp.dot(h, wcat_ref[...], preferred_element_type=jnp.float32)
    z = z + bcat_ref[...]

    z1 = z[:, :hh_pad]                         # lin1 pre-activation (padded cols are 0)
    alpha = z[:, hh_pad:hh_pad + 1]            # w_lin(h) + bias, (tile_n, 1)

    x = z1 * jax.nn.sigmoid(z1)                # SiLU / swish
    t = jnp.dot(x, w2_ref[...], preferred_element_type=jnp.float32) + b2_ref[0, 0]
    s = t * alpha                              # per-node scalar, (tile_n, 1)

    # scatter_add(s, batch) as a one-hot contraction over the node axis; result is
    # a lane-dense (1, Gpad) row accumulated into the resident output block.
    g_pad = out_ref.shape[-1]
    g_ids = jax.lax.broadcasted_iota(jnp.int32, (1, g_pad), 1)
    one_hot = (batch_ref[...] == g_ids).astype(jnp.float32)        # (tile_n, Gpad)
    partial = jax.lax.dot_general(
        s, one_hot, (((0,), (0,)), ((), ())),
        preferred_element_type=jnp.float32)                        # (1, Gpad)
    out_ref[...] += jnp.broadcast_to(partial, out_ref.shape)


def _choose_tile_n(N, H, hh_pad, g_pad, h_bytes):
    """Largest multiple-of-8 node tile that keeps the working set ~<= 16 MiB."""
    wc = hh_pad + 128
    fixed = 2 * (H * wc * h_bytes + wc * 4 + hh_pad * 4) + (1 << 14)  # weights (x2 bufs)
    budget = max(16 * 1024 * 1024 - fixed, 1 << 20)
    per_row = (2 * H * h_bytes      # h, double-buffered
               + 2 * 4              # batch ids, double-buffered
               + wc * 4             # z intermediate (f32)
               + hh_pad * 4         # silu intermediate (f32)
               + g_pad * 4          # one-hot (f32)
               + 64)
    tile_n = budget // per_row
    return int(max(8, min(1024, (tile_n // 8) * 8)))


@functools.partial(jax.jit, static_argnames=("num_graphs", "tile_n", "num_splits"))
def output_block_forward(h, batch, alpha, params, *, num_graphs,
                         tile_n=None, num_splits=None):
    # 'weighted-av-final-embeds': alpha is recomputed from h, so the incoming
    # alpha is intentionally never sent to the kernel (no wasted DMA).
    del alpha
    N, H = h.shape
    Hh = H // 2
    hh_pad = max(128, _round_up(Hh, 128))      # lin1 width padded to lane multiple
    wc = hh_pad + 128                          # + one 128-lane block holding w_lin
    g_pad = _round_up(num_graphs, 128)         # lane-dense graph axis
    h_bytes = h.dtype.itemsize

    if tile_n is None:
        tile_n = _choose_tile_n(N, H, hh_pad, g_pad, h_bytes)
    tile_n = max(8, (int(tile_n) // 8) * 8)
    tile_n = min(tile_n, _round_up(N, 8))

    num_tiles = -(-N // tile_n)
    if num_splits is None:
        num_splits = 2 if num_tiles >= 2 else 1     # megacore split on v7x
    num_splits = int(num_splits)

    chunk = tile_n * num_splits
    n_pad = _round_up(N, chunk)
    tiles_per_split = n_pad // chunk

    # Pad nodes; padded rows get batch id -1 so they scatter nowhere.
    pad = n_pad - N
    batch_i32 = batch.astype(jnp.int32)
    if pad:
        h = jnp.pad(h, ((0, pad), (0, 0)))
        batch_i32 = jnp.pad(batch_i32, ((0, pad),), constant_values=-1)
    batch2d = batch_i32.reshape(n_pad, 1)

    # Fused weight [ w1 | zeros | wl | zeros ]: wl column at lane offset hh_pad.
    w_cat = jnp.zeros((H, wc), jnp.float32)
    w_cat = w_cat.at[:, :Hh].set(params["w1"])
    w_cat = w_cat.at[:, hh_pad].set(params["wl"][:, 0])
    w_cat = w_cat.astype(h.dtype)                                  # native MXU dtype
    b_cat = jnp.zeros((1, wc), jnp.float32)
    b_cat = b_cat.at[:, :Hh].set(params["b1"])
    b_cat = b_cat.at[0, hh_pad].set(params["bl"][0, 0])
    w2_pad = jnp.zeros((hh_pad, 1), jnp.float32).at[:Hh, :].set(params["w2"])
    b2 = params["b2"].reshape(1, 1).astype(jnp.float32)

    grid = (num_splits, tiles_per_split)
    node_map = lambda c, i: (c * tiles_per_split + i, 0)
    const_map = lambda c, i: (0, 0)

    in_specs = [
        pl.BlockSpec((tile_n, H), node_map),                   # h
        pl.BlockSpec((tile_n, 1), node_map),                   # batch ids
        pl.BlockSpec((H, wc), const_map),                      # fused lin1|w_lin weight
        pl.BlockSpec((1, wc), const_map),                      # fused bias
        pl.BlockSpec((hh_pad, 1), const_map),                  # lin2 weight (zero-padded)
        pl.BlockSpec(memory_space=pltpu.MemorySpace.SMEM),     # lin2 bias (scalar)
    ]
    out_specs = pl.BlockSpec((1, 8, g_pad), lambda c, i: (c, 0, 0))

    cost = pl.CostEstimate(
        flops=2 * n_pad * (H * wc + hh_pad + g_pad),
        transcendentals=n_pad * hh_pad,
        bytes_accessed=(n_pad * (H * h_bytes + 4)
                        + (H * wc) * h_bytes + (wc + hh_pad + 1) * 4
                        + num_splits * 8 * g_pad * 4),
    )

    out3 = pl.pallas_call(
        functools.partial(output_block_kernel, hh_pad=hh_pad),
        out_shape=jax.ShapeDtypeStruct((num_splits, 8, g_pad), jnp.float32),
        grid_spec=pltpu.PrefetchScalarGridSpec(
            num_scalar_prefetch=0,
            grid=grid,
            in_specs=in_specs,
            out_specs=out_specs,
        ),
        compiler_params=pltpu.CompilerParams(
            dimension_semantics=("parallel", "arbitrary"),
            vmem_limit_bytes=32 * 1024 * 1024,
        ),
        cost_estimate=cost,
    )(h, batch2d, w_cat, b_cat, w2_pad, b2)

    # Sublane rows 0..7 of each split are identical; sum the per-core partials.
    out = out3[:, 0, :num_graphs].sum(axis=0)
    return out.reshape(num_graphs, 1)


def xavier_uniform(key, fan_in, fan_out, shape):
    bound = (6.0 / (fan_in + fan_out)) ** 0.5
    return jax.random.uniform(key, shape, jnp.float32, -bound, bound)


def init_params(key, hidden_channels):
    H, Hh = hidden_channels, hidden_channels // 2
    k1, k2, k3 = jax.random.split(key, 3)
    # Stored as (in, out) so the kernel does h @ W (equivalent to PyTorch h @ W.T).
    return {
        "w1": xavier_uniform(k1, H, Hh, (H, Hh)),
        "b1": jnp.zeros((1, Hh), jnp.float32),
        "w2": xavier_uniform(k2, Hh, 1, (Hh, 1)),
        "b2": jnp.zeros((1, 1), jnp.float32),
        "wl": xavier_uniform(k3, H, 1, (H, 1)),
        "bl": jnp.zeros((1, 1), jnp.float32),
    }


def reference_forward(h, batch, params, num_graphs):
    alpha = h @ params["wl"] + params["bl"]
    x = h @ params["w1"] + params["b1"]
    x = jax.nn.silu(x)
    x = x @ params["w2"] + params["b2"]
    x = x * alpha
    return jax.ops.segment_sum(x, batch, num_segments=num_graphs)


if __name__ == "__main__":
    key = jax.random.PRNGKey(0)
    k_h, k_b, k_a, k_p, k_h2, k_b2, k_p2 = jax.random.split(key, 7)

    # --- small demo (single tile, single split) ------------------------------
    N, H, num_graphs = 64, 32, 4
    h = jax.random.normal(k_h, (N, H), jnp.float32)
    batch = jnp.sort(jax.random.randint(k_b, (N,), 0, num_graphs)).astype(jnp.int32)
    alpha_in = jax.random.normal(k_a, (N, 1), jnp.float32)   # ignored for this head
    params = init_params(k_p, H)

    out = output_block_forward(h, batch, alpha_in, params, num_graphs=num_graphs)
    out = jax.block_until_ready(out)
    ref = reference_forward(h, batch, params, num_graphs)
    assert out.shape == (num_graphs, 1)
    assert jnp.allclose(out, ref, atol=1e-4, rtol=1e-4), (out, ref)

    # --- multi-tile + 2-way (megacore) split path -----------------------------
    N2, H2, G2 = 512, 64, 6
    h2 = jax.random.normal(k_h2, (N2, H2), jnp.float32)
    batch2 = jnp.sort(jax.random.randint(k_b2, (N2,), 0, G2)).astype(jnp.int32)
    params2 = init_params(k_p2, H2)
    out2 = output_block_forward(h2, batch2, None, params2, num_graphs=G2,
                                tile_n=128, num_splits=2)
    out2 = jax.block_until_ready(out2)
    ref2 = reference_forward(h2, batch2, params2, G2)
    assert out2.shape == (G2, 1)
    assert jnp.allclose(out2, ref2, atol=1e-3, rtol=1e-3), (out2, ref2)

    print("KERNEL_OK")
</pallas_src>

<mosaic_0001>
module attributes {stable_mosaic.version = 11 : i64} {
  func.func @output_block_kernel(%arg0: i32, %arg1: i32, %arg2: memref<64x32xf32, #tpu.memory_space<vmem>>, %arg3: memref<64x1xi32, #tpu.memory_space<vmem>>, %arg4: memref<32x256xf32, #tpu.memory_space<vmem>>, %arg5: memref<1x256xf32, #tpu.memory_space<vmem>>, %arg6: memref<128x1xf32, #tpu.memory_space<vmem>>, %arg7: memref<1x1xf32, #tpu.memory_space<smem>>, %arg8: memref<1x8x128xf32, #tpu.memory_space<vmem>>) attributes {dimension_semantics = [#tpu.dimension_semantics<parallel>, #tpu.dimension_semantics<arbitrary>], iteration_bounds = array<i64: 1, 1>, scalar_prefetch = 0 : i64, scratch_operands = 0 : i64, tpu.core_type = #tpu.core_type<tc>, window_params = [{transform_indices = @transform_0, window_bounds = array<i64: 64, 32>}, {transform_indices = @transform_1, window_bounds = array<i64: 64, 1>}, {pipeline_mode = #tpu.pipeline_mode<synchronous>, transform_indices = @transform_2, window_bounds = array<i64: 32, 256>}, {pipeline_mode = #tpu.pipeline_mode<synchronous>, transform_indices = @transform_3, window_bounds = array<i64: 1, 256>}, {pipeline_mode = #tpu.pipeline_mode<synchronous>, transform_indices = @transform_4, window_bounds = array<i64: 128, 1>}, {transform_indices = @transform_5, window_bounds = array<i64: 1, 1>}, {transform_indices = @transform_6, window_bounds = array<i64: 1, 8, 128>}]} {
    %c0_i32 = arith.constant 0 : i32
    %0 = arith.cmpi eq, %arg1, %c0_i32 : i32
    %1 = arith.extui %0 : i1 to i32
    %c0_i32_0 = arith.constant 0 : i32
    %2 = arith.cmpi ne, %1, %c0_i32_0 : i32
    scf.if %2 {
      %cst_21 = arith.constant 0.000000e+00 : f32
      %36 = vector.broadcast %cst_21 : f32 to vector<1x8x128xf32>
      %c0_22 = arith.constant 0 : index
      %c0_23 = arith.constant 0 : index
      %c0_24 = arith.constant 0 : index
      %37 = vector.load %arg8[%c0_22, %c0_23, %c0_24] : memref<1x8x128xf32, #tpu.memory_space<vmem>>, vector<1x8x128xf32>
      tpu.vector_store %arg8[%c0_22, %c0_23, %c0_24], %36 {strides = array<i32>} : memref<1x8x128xf32, #tpu.memory_space<vmem>>, vector<1x8x128xf32>,
    } else {
    }
    %c0 = arith.constant 0 : index
    %c0_1 = arith.constant 0 : index
    %3 = vector.load %arg2[%c0, %c0_1] : memref<64x32xf32, #tpu.memory_space<vmem>>, vector<64x32xf32>
    %c0_2 = arith.constant 0 : index
    %c0_3 = arith.constant 0 : index
    %4 = vector.load %arg4[%c0_2, %c0_3] : memref<32x256xf32, #tpu.memory_space<vmem>>, vector<32x256xf32>
    %cst = arith.constant dense<0.000000e+00> : vector<64x256xf32>
    %5 = tpu.matmul %3, %4, %cst {dimension_numbers = #tpu.dot_dimension_numbers<[1], [0], [0], [1], [0, 0, 1, 1], [], []>} : vector<64x32xf32>, vector<32x256xf32>, vector<64x256xf32> -> vector<64x256xf32>
    %c0_4 = arith.constant 0 : index
    %c0_5 = arith.constant 0 : index
    %6 = vector.load %arg5[%c0_4, %c0_5] : memref<1x256xf32, #tpu.memory_space<vmem>>, vector<1x256xf32>
    %7 = vector.broadcast %6 : vector<1x256xf32> to vector<64x256xf32>
    %8 = arith.addf %5, %7 : vector<64x256xf32>
    %9 = vector.extract_strided_slice %8 {offsets = [0, 0], sizes = [64, 128], strides = [1, 1]} : vector<64x256xf32> to vector<64x128xf32>
    %10 = vector.extract_strided_slice %8 {offsets = [0, 128], sizes = [64, 1], strides = [1, 1]} : vector<64x256xf32> to vector<64x1xf32>
    %11 = arith.negf %9 : vector<64x128xf32>
    %12 = math.exp %11 : vector<64x128xf32>
    %cst_6 = arith.constant 1.000000e+00 : f32
    %13 = vector.broadcast %cst_6 : f32 to vector<64x128xf32>
    %14 = arith.addf %13, %12 : vector<64x128xf32>
    %15 = arith.divf %13, %14 : vector<64x128xf32>
    %16 = arith.mulf %9, %15 : vector<64x128xf32>
    %c0_7 = arith.constant 0 : index
    %c0_8 = arith.constant 0 : index
    %17 = vector.load %arg6[%c0_7, %c0_8] : memref<128x1xf32, #tpu.memory_space<vmem>>, vector<128x1xf32>
    %cst_9 = arith.constant dense<0.000000e+00> : vector<64x1xf32>
    %18 = tpu.matmul %16, %17, %cst_9 {dimension_numbers = #tpu.dot_dimension_numbers<[1], [0], [0], [1], [0, 0, 1, 1], [], []>} : vector<64x128xf32>, vector<128x1xf32>, vector<64x1xf32> -> vector<64x1xf32>
    %c0_10 = arith.constant 0 : index
    %c0_11 = arith.constant 0 : index
    %19 = memref.load %arg7[%c0_10, %c0_11] : memref<1x1xf32, #tpu.memory_space<smem>>
    %20 = vector.broadcast %19 : f32 to vector<64x1xf32>
    %21 = arith.addf %18, %20 : vector<64x1xf32>
    %22 = arith.mulf %21, %10 : vector<64x1xf32>
    %23 = tpu.iota {dimensions = array<i32: 1>} : vector<1x128xi32>
    %c0_12 = arith.constant 0 : index
    %c0_13 = arith.constant 0 : index
    %24 = vector.load %arg3[%c0_12, %c0_13] : memref<64x1xi32, #tpu.memory_space<vmem>>, vector<64x1xi32>
    %25 = vector.broadcast %24 : vector<64x1xi32> to vector<64x128xi32>
    %26 = vector.broadcast %23 : vector<1x128xi32> to vector<64x128xi32>
    %27 = arith.cmpi eq, %25, %26 : vector<64x128xi32>
    %28 = arith.extui %27 : vector<64x128xi1> to vector<64x128xi32>
    %29 = arith.sitofp %28 : vector<64x128xi32> to vector<64x128xf32>
    %cst_14 = arith.constant dense<0.000000e+00> : vector<1x128xf32>
    %30 = tpu.matmul %22, %29, %cst_14 {dimension_numbers = #tpu.dot_dimension_numbers<[0], [0], [1], [1], [0, 1, 1, 1], [], []>} : vector<64x1xf32>, vector<64x128xf32>, vector<1x128xf32> -> vector<1x128xf32>
    %c0_15 = arith.constant 0 : index
    %c0_16 = arith.constant 0 : index
    %c0_17 = arith.constant 0 : index
    %31 = vector.load %arg8[%c0_15, %c0_16, %c0_17] : memref<1x8x128xf32, #tpu.memory_space<vmem>>, vector<1x8x128xf32>
    %32 = vector.shape_cast %30 : vector<1x128xf32> to vector<1x1x128xf32>
    %33 = vector.broadcast %32 : vector<1x1x128xf32> to vector<1x8x128xf32>
    %34 = arith.addf %31, %33 : vector<1x8x128xf32>
    %c0_18 = arith.constant 0 : index
    %c0_19 = arith.constant 0 : index
    %c0_20 = arith.constant 0 : index
    %35 = vector.load %arg8[%c0_18, %c0_19, %c0_20] : memref<1x8x128xf32, #tpu.memory_space<vmem>>, vector<1x8x128xf32>
    tpu.vector_store %arg8[%c0_18, %c0_19, %c0_20], %34 {strides = array<i32>} : memref<1x8x128xf32, #tpu.memory_space<vmem>>, vector<1x8x128xf32>,
    return
  }
  func.func @transform_0(%arg0: i32, %arg1: i32) -> (i32, i32) {
    %c1_i32 = arith.constant 1 : i32
    %0 = arith.muli %arg0, %c1_i32 : i32
    %1 = arith.addi %0, %arg1 : i32
    %c0_i32 = arith.constant 0 : i32
    %c0_i32_0 = arith.constant 0 : i32
    return %1, %c0_i32 : i32, i32
  }
  func.func @transform_1(%arg0: i32, %arg1: i32) -> (i32, i32) {
    %c1_i32 = arith.constant 1 : i32
    %0 = arith.muli %arg0, %c1_i32 : i32
    %1 = arith.addi %0, %arg1 : i32
    %c0_i32 = arith.constant 0 : i32
    %c0_i32_0 = arith.constant 0 : i32
    return %1, %c0_i32 : i32, i32
  }
  func.func @transform_2(%arg0: i32, %arg1: i32) -> (i32, i32) {
    %c0_i32 = arith.constant 0 : i32
    %c0_i32_0 = arith.constant 0 : i32
    %c0_i32_1 = arith.constant 0 : i32
    return %c0_i32, %c0_i32_0 : i32, i32
  }
  func.func @transform_3(%arg0: i32, %arg1: i32) -> (i32, i32) {
    %c0_i32 = arith.constant 0 : i32
    %c0_i32_0 = arith.constant 0 : i32
    %c0_i32_1 = arith.constant 0 : i32
    return %c0_i32, %c0_i32_0 : i32, i32
  }
  func.func @transform_4(%arg0: i32, %arg1: i32) -> (i32, i32) {
    %c0_i32 = arith.constant 0 : i32
    %c0_i32_0 = arith.constant 0 : i32
    %c0_i32_1 = arith.constant 0 : i32
    return %c0_i32, %c0_i32_0 : i32, i32
  }
  func.func @transform_5(%arg0: i32, %arg1: i32) -> (i32, i32) {
    %c0_i32 = arith.constant 0 : i32
    %c0_i32_0 = arith.constant 0 : i32
    %c0_i32_1 = arith.constant 0 : i32
    return %c0_i32, %c0_i32_0 : i32, i32
  }
  func.func @transform_6(%arg0: i32, %arg1: i32) -> (i32, i32, i32) {
    %c0_i32 = arith.constant 0 : i32
    %c0_i32_0 = arith.constant 0 : i32
    %c0_i32_1 = arith.constant 0 : i32
    return %arg0, %c0_i32, %c0_i32_0 : i32, i32, i32
  }
}

</mosaic_0001>

<bundles_post_ra>
// kernel: output_block_forward.1
= control target key start
LH: loop header
LB: loop body
LE: loop exit
PB: predicated region body
PF: predicated region fallthrough
CT: control target
= control target key end

     0   :  { %v780_v3 = vmov 0.0   ;;  %vm101_vm0 = vcmask 261120   ;;  %v781_v33 = vmov 0   ;;  %v91_v42 = vlaneseq  ;;  %s1008_s2 = inlined_call_operand.vmem [shape: f32[32,256], index: 2, kind: input, shape index: {}]   ;;  %s1009_s0 = inlined_call_operand.vmem [shape: f32[64,32], index: 0, kind: input, shape index: {}]   ;;  %s1010_s4 = inlined_call_operand.vmem [shape: f32[128,1], index: 4, kind: input, shape index: {}]   ;;  %s1011_s1 = inlined_call_operand.vmem [shape: s32[64,1], index: 1, kind: input, shape index: {}]   ;;  %s1012_s3 = inlined_call_operand.vmem [shape: f32[1,256], index: 3, kind: input, shape index: {}]   ;;  %s1013_s5 = inlined_call_operand.<no memory space> [shape: f32[1,1], index: 5, kind: input, shape index: {}]   ;;  %s1014_s6 = inlined_call_operand.vmem [shape: f32[1,8,128], index: 6, kind: output, shape index: {}]  }
   0x1   :  { %v88_v0 = vld [vmem:[%s1008_s2 + $0x38] sm:$0xff]  ;;  %v87_v1 = vld [vmem:[%s1008_s2 + $0x30] sm:$0xff]  ;;  %v86_v2 = vld [vmem:[%s1008_s2 + $0x28] sm:$0xff]  ;;  %190 = vmatprep.mubr.f32.mxu0 %v780_v3  ;;  %746 = vset.pattern.permute.xlu0 %v781_v33  ;;  %vm782_vm1 = vmmov 0   ;;  %vm516_vm10 = vcmask 523264  }
   0x2   :  { %150 = vmatprep.subr.mxu0 %v88_v0  ;;  %v85_v4 = vld [vmem:[%s1008_s2 + $0x20] sm:$0xff]  ;;  %v84_v5 = vld [vmem:[%s1008_s2 + $0x18] sm:$0xff]  ;;  %v83_v6 = vld [vmem:[%s1008_s2 + $0x10] sm:$0xff]  ;;  %747 = vset.pattern.permute.xlu1 %v781_v33  ;;  %v957_v43 = vshrl.u32 %v91_v42, 7 }
   0x3   :  { %151 = vmatpush1.msra.mxu0 %v87_v1  ;;  %v82_v7 = vld [vmem:[%s1008_s2 + $0x8] sm:$0xff]  ;;  %v81_v8 = vld [vmem:[%s1008_s2] sm:$0xff]  ;;  %v75_v11 = vld [vmem:[%s1009_s0 + $0x10] sm:$0xff] }
   0x4   :  { %152 = vmatprep.subr.mxu0 %v86_v2  ;;  %v73_v9 = vld [vmem:[%s1009_s0] sm:$0xff]  ;;  %v74_v10 = vld [vmem:[%s1009_s0 + $0x8] sm:$0xff]  ;;  %v76_v12 = vld [vmem:[%s1009_s0 + $0x18] sm:$0xff]  ;;  %v93_v44 = vsub.s32 0, %v957_v43 }
   0x5   :  { %153 = vmatpush1.msra.mxu0 %v85_v4  ;;  %v77_v13 = vld [vmem:[%s1009_s0 + $0x20] sm:$0xff]  ;;  %v78_v14 = vld [vmem:[%s1009_s0 + $0x28] sm:$0xff]  ;;  %v79_v15 = vld [vmem:[%s1009_s0 + $0x30] sm:$0xff] }
   0x6   :  { %154 = vmatprep.subr.mxu0 %v84_v5  ;;  %v80_v16 = vld [vmem:[%s1009_s0 + $0x38] sm:$0xff]  ;;  %v309_v18 = vld [vmem:[%s1010_s4 + $0x70] sm:$0xff]  ;;  %v308_v19 = vld [vmem:[%s1010_s4 + $0x68] sm:$0xff] }
   0x7   :  { %155 = vmatpush1.msra.mxu0 %v83_v6  ;;  %v310_v17 = vld [vmem:[%s1010_s4 + $0x78] sm:$0xff]  ;;  %v307_v20 = vld [vmem:[%s1010_s4 + $0x60] sm:$0xff]  ;;  %v305_v22 = vld [vmem:[%s1010_s4 + $0x50] sm:$0xff] }
   0x8   :  { %156 = vmatprep.subr.mxu0 %v82_v7  ;;  %679 = vmatprep.subr.mxu1 %v310_v17  ;;  %v306_v21 = vld [vmem:[%s1010_s4 + $0x58] sm:$0xff]  ;;  %v304_v23 = vld [vmem:[%s1010_s4 + $0x48] sm:$0xff]  ;;  %v303_v24 = vld [vmem:[%s1010_s4 + $0x40] sm:$0xff] }
   0x9   :  { %157 = vmatpush1.msra.mxu0 %v81_v8  ;;  %680 = vmatpush3.msra.mxu1 %v310_v17  ;;  %v302_v25 = vld [vmem:[%s1010_s4 + $0x38] sm:$0xff]  ;;  %v301_v26 = vld [vmem:[%s1010_s4 + $0x30] sm:$0xff]  ;;  %v300_v27 = vld [vmem:[%s1010_s4 + $0x28] sm:$0xff] }
   0xa   :  { %613 = vmatmul.mubr.msk.f32.vlgmr.msra.gmra.mxu0 %vm101_vm0, %v73_v9  ;;  %723 = vmatprep.subr.mxu0 %v780_v3  ;;  %v299_v28 = vld [vmem:[%s1010_s4 + $0x20] sm:$0xff]  ;;  %v298_v29 = vld [vmem:[%s1010_s4 + $0x18] sm:$0xff]  ;;  %v297_v30 = vld [vmem:[%s1010_s4 + $0x10] sm:$0xff] }
   0xb   :  { %196 = vmatprep.mubr.f32.mxu0 %v780_v3  ;;  %681 = vmatprep.subr.mxu1 %v309_v18  ;;  %v296_v31 = vld [vmem:[%s1010_s4 + $0x8] sm:$0xff]  ;;  %v295_v32 = vld [vmem:[%s1010_s4] sm:$0xff]  ;;  %v435_v34 = vld [vmem:[%s1011_s1 + $0x38] sm:$0xff] }
   0xc   :  { %682 = vmatpush3.msra.mxu1 %v309_v18  ;;  %v433_v35 = vld [vmem:[%s1011_s1 + $0x28] sm:$0xff]  ;;  %458 = vperm.xlu0 %746, %v435_v34   ;;  %v434_v36 = vld [vmem:[%s1011_s1 + $0x30] sm:$0xff]  ;;  %v432_v37 = vld [vmem:[%s1011_s1 + $0x20] sm:$0xff] }
   0xd   :  { %683 = vmatprep.subr.mxu1 %v308_v19  ;;  %452 = vperm.xlu1 %747, %v433_v35   ;;  %v431_v38 = vld [vmem:[%s1011_s1 + $0x18] sm:$0xff]  ;;  %v430_v39 = vld [vmem:[%s1011_s1 + $0x10] sm:$0xff]  ;;  %v429_v40 = vld [vmem:[%s1011_s1 + $0x8] sm:$0xff] }
   0xe   :  { %614 = vmatmul.mubr.msk.f32.gmra.mxu0 %vm101_vm0, %v74_v10  ;;  %684 = vmatpush3.msra.mxu1 %v308_v19  ;;  %v428_v41 = vld [vmem:[%s1011_s1] sm:$0xff] }
   0xf   :  { %202 = vmatprep.mubr.f32.mxu0 %v780_v3  ;;  %685 = vmatprep.subr.mxu1 %v307_v20  ;;  %v963_v45 = vld [vmem:[%s1012_s3] sm:$0x3] }
  0x10   :  { %686 = vmatpush3.msra.mxu1 %v307_v20  ;;  %455 = vperm.xlu0 %746, %v434_v36   ;;  %v94_v46 = vrot.slane %v963_v45, %v93_v44 }
  0x11   :  { %687 = vmatprep.subr.mxu1 %v306_v21  ;;  %449 = vperm.xlu1 %747, %v432_v37  }
  0x12   :  { %615 = vmatmul.mubr.msk.f32.gmra.mxu0 %vm101_vm0, %v75_v11  ;;  %688 = vmatpush3.msra.mxu1 %v306_v21 }
  0x13   :  { %208 = vmatprep.mubr.f32.mxu0 %v780_v3  ;;  %689 = vmatprep.subr.mxu1 %v305_v22 }
  0x14   :  { %690 = vmatpush3.msra.mxu1 %v305_v22  ;;  %446 = vperm.xlu0 %746, %v431_v38  }
  0x15   :  { %691 = vmatprep.subr.mxu1 %v304_v23  ;;  %443 = vperm.xlu1 %747, %v430_v39  }
  0x16   :  { %616 = vmatmul.mubr.msk.f32.gmra.mxu0 %vm101_vm0, %v76_v12  ;;  %692 = vmatpush3.msra.mxu1 %v304_v23 }
  0x17   :  { %214 = vmatprep.mubr.f32.mxu0 %v780_v3  ;;  %693 = vmatprep.subr.mxu1 %v303_v24 }
  0x18   :  { %694 = vmatpush3.msra.mxu1 %v303_v24  ;;  %440 = vperm.xlu0 %746, %v429_v40  }
  0x19   :  { %695 = vmatprep.subr.mxu1 %v302_v25  ;;  %437 = vperm.xlu1 %747, %v428_v41  }
  0x1a   :  { %617 = vmatmul.mubr.msk.f32.gmra.mxu0 %vm101_vm0, %v77_v13  ;;  %696 = vmatpush3.msra.mxu1 %v302_v25 }
  0x1b   :  { %220 = vmatprep.mubr.f32.mxu0 %v780_v3  ;;  %697 = vmatprep.subr.mxu1 %v301_v26 }
  0x1c   :  { %698 = vmatpush3.msra.mxu1 %v301_v26 }
  0x1d   :  { %699 = vmatprep.subr.mxu1 %v300_v27 }
  0x1e   :  { %618 = vmatmul.mubr.msk.f32.gmra.mxu0 %vm101_vm0, %v78_v14  ;;  %700 = vmatpush3.msra.mxu1 %v300_v27 }
  0x1f   :  { %226 = vmatprep.mubr.f32.mxu0 %v780_v3  ;;  %701 = vmatprep.subr.mxu1 %v299_v28 }
  0x20   :  { %702 = vmatpush3.msra.mxu1 %v299_v28 }
  0x21   :  { %703 = vmatprep.subr.mxu1 %v298_v29 }
  0x22   :  { %619 = vmatmul.mubr.msk.f32.gmra.mxu0 %vm101_vm0, %v79_v15  ;;  %704 = vmatpush3.msra.mxu1 %v298_v29 }
  0x23   :  { %232 = vmatprep.mubr.f32.mxu0 %v780_v3  ;;  %705 = vmatprep.subr.mxu1 %v297_v30 }
  0x24   :  { %706 = vmatpush3.msra.mxu1 %v297_v30 }
  0x25   :  { %707 = vmatprep.subr.mxu1 %v296_v31 }
  0x26   :  { %620 = vmatmul.mubr.msk.f32.gmra.mxu0 %vm101_vm0, %v80_v16  ;;  %708 = vmatpush3.msra.mxu1 %v296_v31 }
  0x27   :  { %709 = vmatprep.subr.mxu1 %v295_v32  ;;  %739 = vmatprep.mubr.msk.f32.mxu0 %vm782_vm1, %v780_v3 }
  0x28   :  { %710 = vmatpush3.msra.mxu1 %v295_v32 }
  0xca   :  { %v192_v47 = vpop.f32.mrf.mxu0 }
  0xcb   :  { %v193_v48 = vadd.f32 %v192_v47, %v94_v46 }
  0xcc   :  { %v968_v49 = vpop.f32.mrf.mxu0 }
  0xcd   :  { %v621_v50 = vmul.f32 -1.442695, %v193_v48 }
  0xce   :  { %v198_v51 = vpop.f32.mrf.mxu0 }
  0xcf   :  { %748 = vpow2.f32 %v621_v50  ;;  %v199_v52 = vadd.f32 %v198_v51, %v94_v46 }
  0xd0   :  { %v970_v53 = vpop.f32.mrf.mxu0 }
  0xd1   :  { %v622_v54 = vmul.f32 -1.442695, %v199_v52 }
  0xd2   :  { %v204_v55 = vpop.f32.mrf.mxu0 }
  0xd3   :  { %750 = vpow2.f32 %v622_v54  ;;  %v205_v56 = vadd.f32 %v204_v55, %v94_v46  ;;  %v459_v54 = vpop.permute.xlu0 %458  ;;  %v453_v55 = vpop.permute.xlu1 %452 }
  0xd4   :  { %v972_v57 = vpop.f32.mrf.mxu0 }
  0xd5   :  { %v623_v58 = vmul.f32 -1.442695, %v205_v56 }
  0xd6   :  { %v210_v59 = vpop.f32.mrf.mxu0 }
  0xd7   :  { %752 = vpow2.f32 %v623_v58  ;;  %v211_v60 = vadd.f32 %v210_v59, %v94_v46  ;;  %v456_v58 = vpop.permute.xlu0 %455  ;;  %v450_v59 = vpop.permute.xlu1 %449 }
  0xd8   :  { %v974_v61 = vpop.f32.mrf.mxu0 }
  0xd9   :  { %v624_v62 = vmul.f32 -1.442695, %v211_v60 }
  0xda   :  { %v216_v63 = vpop.f32.mrf.mxu0 }
  0xdb   :  { %754 = vpow2.f32 %v624_v62  ;;  %v217_v0 = vadd.f32 %v216_v63, %v94_v46 }
  0xdc   :  { %v749_v1 = vpop.eup %748  ;;  %v976_v2 = vpop.f32.mrf.mxu0 }
  0xdd   :  { %v263_v4 = vadd.f32 1.0, %v749_v1  ;;  %v625_v5 = vmul.f32 -1.442695, %v217_v0 }
  0xde   :  { %v222_v6 = vpop.f32.mrf.mxu0 }
  0xdf   :  { %756 = vrcp.f32 %v263_v4  ;;  %v223_v7 = vadd.f32 %v222_v6, %v94_v46 }
  0xe0   :  { %v751_v8 = vpop.eup %750  ;;  %758 = vpow2.f32 %v625_v5  ;;  %v978_v9 = vpop.f32.mrf.mxu0  ;;  %v312_v5 = vstv %s1013_s5 }
  0xe1   :  { %v264_v10 = vadd.f32 1.0, %v751_v8  ;;  %v626_v11 = vmul.f32 -1.442695, %v223_v7 }
  0xe2   :  { %v228_v12 = vpop.f32.mrf.mxu0 }
  0xe3   :  { %760 = vrcp.f32 %v264_v10  ;;  %v229_v13 = vadd.f32 %v228_v12, %v94_v46 }
  0xe4   :  { %v753_v14 = vpop.eup %752  ;;  %762 = vpow2.f32 %v626_v11  ;;  %v980_v15 = vpop.f32.mrf.mxu0 }
  0xe5   :  { %v265_v16 = vadd.f32 1.0, %v753_v14  ;;  %v627_v17 = vmul.f32 -1.442695, %v229_v13 }
  0xe6   :  { %v234_v18 = vpop.f32.mrf.mxu0 }
  0xe7   :  { %764 = vrcp.f32 %v265_v16  ;;  %v235_v19 = vadd.f32 %v234_v18, %v94_v46 }
  0xe8   :  { %v755_v20 = vpop.eup %754  ;;  %766 = vpow2.f32 %v627_v17 }
  0xe9   :  { %v266_v21 = vadd.f32 1.0, %v755_v20  ;;  %v628_v22 = vmul.f32 -1.442695, %v235_v19 }
  0xeb   :  { %768 = vrcp.f32 %v266_v21 }
  0xec   :  { %v757_v23 = vpop.eup %756  ;;  %770 = vpow2.f32 %v628_v22 }
  0xed   :  { %v759_v24 = vpop.eup %758  ;;  %v287_v25 = vmul.f32 %v757_v23, %v193_v48 }
  0xee   :  { %v267_v26 = vadd.f32 1.0, %v759_v24 }
  0xef   :  { %711 = vmatprep.mubr.f32.mxu1 %v287_v25 }
  0xf0   :  { %v761_v27 = vpop.eup %760  ;;  %772 = vrcp.f32 %v267_v26 }
  0xf1   :  { %v763_v28 = vpop.eup %762  ;;  %v288_v29 = vmul.f32 %v761_v27, %v199_v52  ;;  %v427_v52 = vand.u32 127, %v91_v42  ;;  %v447_v42 = vpop.permute.xlu0 %446 }
  0xf2   :  { %v268_v30 = vadd.f32 1.0, %v763_v28 }
  0xf3   :  { %712 = vmatmul.mubr.f32.vlgmr.msra.gmra.mxu1 %v288_v29  ;;  %vm467_vm2 = vcmp.eq.s32.totalorder %v459_v54, %v427_v52  ;;  %vm466_vm3 = vcmp.eq.s32.totalorder %v456_v58, %v427_v52  ;;  %vm465_vm4 = vcmp.eq.s32.totalorder %v453_v55, %v427_v52  ;;  %vm464_vm5 = vcmp.eq.s32.totalorder %v450_v59, %v427_v52 }
  0xf4   :  { %v765_v31 = vpop.eup %764  ;;  %774 = vrcp.f32 %v268_v30  ;;  %vm463_vm6 = vcmp.eq.s32.totalorder %v447_v42, %v427_v52 }
  0xf5   :  { %v767_v32 = vpop.eup %766  ;;  %v289_v33 = vmul.f32 %v765_v31, %v205_v56  ;;  %v783_v56 = vmov 1.0   ;;  %v441_v62 = vpop.permute.xlu0 %440 }
  0xf6   :  { %v269_v34 = vadd.f32 1.0, %v767_v32  ;;  %724 = vmatpush3.msk.msra.mxu0 %vm467_vm2, %v783_v56  ;;  %vm461_vm8 = vcmp.eq.s32.totalorder %v441_v62, %v427_v52 }
  0xf7   :  { %714 = vmatprep.mubr.f32.mxu1 %v289_v33  ;;  %725 = vmatprep.subr.mxu0 %v780_v3 }
  0xf8   :  { %v769_v35 = vpop.eup %768  ;;  %776 = vrcp.f32 %v269_v34  ;;  %726 = vmatpush3.msk.msra.mxu0 %vm466_vm3, %v783_v56 }
  0xf9   :  { %v771_v36 = vpop.eup %770  ;;  %v290_v37 = vmul.f32 %v769_v35, %v211_v60  ;;  %727 = vmatprep.subr.mxu0 %v780_v3  ;;  %v444_v60 = vpop.permute.xlu1 %443 }
  0xfa   :  { %v270_v38 = vadd.f32 1.0, %v771_v36  ;;  %728 = vmatpush3.msk.msra.mxu0 %vm465_vm4, %v783_v56  ;;  %vm462_vm7 = vcmp.eq.s32.totalorder %v444_v60, %v427_v52 }
  0xfb   :  { %715 = vmatmul.mubr.f32.gmra.mxu1 %v290_v37  ;;  %729 = vmatprep.subr.mxu0 %v780_v3 }
  0xfc   :  { %778 = vrcp.f32 %v270_v38  ;;  %730 = vmatpush3.msk.msra.mxu0 %vm464_vm5, %v783_v56 }
  0xfd   :  { %v773_v39 = vpop.eup %772  ;;  %731 = vmatprep.subr.mxu0 %v780_v3  ;;  %v438_v63 = vpop.permute.xlu1 %437 }
  0xfe   :  { %v291_v40 = vmul.f32 %v773_v39, %v217_v0  ;;  %732 = vmatpush3.msk.msra.mxu0 %vm463_vm6, %v783_v56  ;;  %vm460_vm9 = vcmp.eq.s32.totalorder %v438_v63, %v427_v52  ;;  %v97_v0 = vsub.s32 1, %v957_v43 }
  0xff   :  { %733 = vmatprep.subr.mxu0 %v780_v3 }
 0x100   :  { %717 = vmatprep.mubr.f32.mxu1 %v291_v40  ;;  %734 = vmatpush3.msk.msra.mxu0 %vm462_vm7, %v783_v56  ;;  %v98_v1 = vrot.slane %v963_v45, %v97_v0 }
 0x101   :  { %v775_v41 = vpop.eup %774  ;;  %735 = vmatprep.subr.mxu0 %v780_v3 }
 0x102   :  { %v292_v46 = vmul.f32 %v775_v41, %v223_v7  ;;  %736 = vmatpush3.msk.msra.mxu0 %vm461_vm8, %v783_v56  ;;  %v195_v7 = vadd.f32 %v968_v49, %v98_v1  ;;  %v201_v12 = vadd.f32 %v970_v53, %v98_v1  ;;  %v207_v16 = vadd.f32 %v972_v57, %v98_v1 }
 0x103   :  { %737 = vmatprep.subr.mxu0 %v780_v3  ;;  %v219_v22 = vadd.f32 %v976_v2, %v98_v1  ;;  %v225_v25 = vadd.f32 %v978_v9, %v98_v1  ;;  %v231_v28 = vadd.f32 %v980_v15, %v98_v1 }
 0x104   :  { %718 = vmatmul.mubr.f32.gmra.mxu1 %v292_v46  ;;  %738 = vmatpush3.msk.msra.mxu0 %vm460_vm9, %v783_v56 }
 0x105   :  { %v777_v47 = vpop.eup %776 }
 0x106   :  { %v293_v48 = vmul.f32 %v777_v47, %v229_v13 }
 0x108   :  { %720 = vmatprep.mubr.f32.mxu1 %v293_v48 }
 0x109   :  { %v779_v50 = vpop.eup %778 }
 0x10a   :  { %v294_v51 = vmul.f32 %v779_v50, %v235_v19  ;;  %v213_v19 = vadd.f32 %v974_v61, %v98_v1  ;;  %v236_v61 = vpop.f32.mrf.mxu0 }
 0x10b   :  { %v237_v32 = vadd.f32 %v236_v61, %v98_v1 }
 0x10c   :  { %721 = vmatmul.mubr.f32.gmra.mxu1 %v294_v51 }
 0x1b3   :  { %v713_v4 = vpop.f32.mrf.mxu1 }
 0x1b4   :  { %v385_v10 = vadd.f32 %v713_v4, %v312_v5 }
 0x1b5   :  { %v379_v6 = vpop.f32.mrf.mxu1 }
 0x1b6   :  { %v380_v8 = vadd.f32 %v379_v6, %v312_v5  ;;  %v419_v13 = vmul.f32 %v385_v10, %v201_v12 }
 0x1b8   :  { %v418_v11 = vmul.f32 %v380_v8, %v195_v7 }
 0x1ba   :  { %484 = vxpose.xlu0.b32.start [1/8] (short) (narrow) %v418_v11, 8 }
 0x1bb   :  { %v716_v3 = vpop.f32.mrf.mxu1 }
 0x1bc   :  { %v395_v17 = vadd.f32 %v716_v3, %v312_v5 }
 0x1bd   :  { %v389_v14 = vpop.f32.mrf.mxu1 }
 0x1be   :  { %v390_v45 = vadd.f32 %v389_v14, %v312_v5  ;;  %485 = vxpose.xlu0.b32.cont [2/8] (short) (narrow) %v419_v13, 8  ;;  %v421_v20 = vmul.f32 %v395_v17, %v213_v19 }
 0x1c0   :  { %v420_v18 = vmul.f32 %v390_v45, %v207_v16 }
 0x1c2   :  { %486 = vxpose.xlu0.b32.cont [3/8] (short) (narrow) %v420_v18, 8 }
 0x1c4   :  { %v719_v49 = vpop.f32.mrf.mxu1 }
 0x1c5   :  { %v405_v23 = vadd.f32 %v719_v49, %v312_v5 }
 0x1c6   :  { %v399_v21 = vpop.f32.mrf.mxu1  ;;  %487 = vxpose.xlu0.b32.cont [4/8] (short) (narrow) %v421_v20, 8 }
 0x1c7   :  { %v400_v53 = vadd.f32 %v399_v21, %v312_v5  ;;  %v423_v26 = vmul.f32 %v405_v23, %v225_v25 }
 0x1c9   :  { %v422_v24 = vmul.f32 %v400_v53, %v219_v22 }
 0x1cb   :  { %488 = vxpose.xlu0.b32.cont [5/8] (short) (narrow) %v422_v24, 8 }
 0x1cc   :  { %v722_v57 = vpop.f32.mrf.mxu1 }
 0x1cd   :  { %v415_v30 = vadd.f32 %v722_v57, %v312_v5 }
 0x1ce   :  { %v409_v27 = vpop.f32.mrf.mxu1 }
 0x1cf   :  { %v410_v29 = vadd.f32 %v409_v27, %v312_v5  ;;  %489 = vxpose.xlu0.b32.cont [6/8] (short) (narrow) %v423_v26, 8  ;;  %v425_v33 = vmul.f32 %v415_v30, %v237_v32 }
 0x1d1   :  { %v424_v31 = vmul.f32 %v410_v29, %v231_v28 }
 0x1d3   :  { %490 = vxpose.xlu0.b32.cont [7/8] (short) (narrow) %v424_v31, 8 }
 0x1d7   :  { %491 = vxpose.xlu0.b32.end [8/8] (short) (narrow) %v425_v33, 8 }
 0x237   :  { %v500_v2 = vpop.trf.xlu0 }
 0x238   :  { %740 = vmatmul.mubr.msk.f32.vlgmr.msra.gmra.mxu0 %vm516_vm10, %v500_v2 }
 0x2f8   :  { %v586_v34 = vpop.f32.mrf.mxu0 }
 0x2f9   :  { %v594_v9 = vrot.slane %v586_v34, %v93_v44 }
 0x2fa   :  { %v741_v35 = vpop.f32.mrf.mxu0 }
 0x2fb   :  { %596 = vst [vmem:[%s1014_s6] sm:$0xff] %v594_v9 }

</bundles_post_ra>
